<compile_context>
chip_gen: v7x
topology: tpu7x:2x2x1
jax: 0.10.0
libtpu: 0.0.40
codegen_flags: <defaults>
</compile_context>

<pallas_src>
import functools

import jax
import jax.numpy as jnp
from jax import lax
from jax.experimental import pallas as pl
from jax.experimental.pallas import tpu as pltpu

_LANE = 128
_SUBLANE = 8


def _round_up(x, m):
    return ((x + m - 1) // m) * m


def _gelu_exact(x):
    # PyTorch F.gelu default: exact erf-based GELU (kept for parity).
    return 0.5 * x * (1.0 + lax.erf(x * jnp.float32(0.7071067811865476)))


def mlp_kernel(*refs, n_h_layers, normalize_output, out_feats, eps):
    if n_h_layers > 0:
        (x_ref, w_in_ref, b_in_ref, hw_ref, hb_ref,
         w_out_ref, b_out_ref, gamma_ref, beta_ref, o_ref) = refs
    else:
        (x_ref, w_in_ref, b_in_ref,
         w_out_ref, b_out_ref, gamma_ref, beta_ref, o_ref) = refs
        hw_ref = hb_ref = None

    # Input layer: bf16 MXU operands, f32 accumulation, then exact GELU (f32).
    f = jnp.dot(x_ref[...].astype(jnp.bfloat16), w_in_ref[...],
                preferred_element_type=jnp.float32) + b_in_ref[...]
    f = _gelu_exact(f)

    # Hidden layers (unrolled; n_h_layers is a Python constant).
    if n_h_layers > 0:
        hb_all = hb_ref[...]                      # (n_h, Lp) f32
        for i in range(n_h_layers):
            w_i = hw_ref[i]                       # (Lp, Lp) bf16
            b_i = hb_all[i:i + 1, :]              # (1, Lp)  f32
            f = jnp.dot(f.astype(jnp.bfloat16), w_i,
                        preferred_element_type=jnp.float32) + b_i
            f = _gelu_exact(f)

    # Output layer.
    f = jnp.dot(f.astype(jnp.bfloat16), w_out_ref[...],
                preferred_element_type=jnp.float32) + b_out_ref[...]

    if normalize_output:
        # LayerNorm over the REAL out_feats columns (padded columns of f are
        # exactly zero because W/b padding is zero, so the full-row sum equals
        # the sum over real columns; variance is explicitly masked).
        out_pad = f.shape[-1]
        mask = lax.broadcasted_iota(jnp.int32, (1, out_pad), 1) < out_feats
        inv_n = jnp.float32(1.0 / out_feats)
        mean = jnp.sum(f, axis=-1, keepdims=True) * inv_n
        d = jnp.where(mask, f - mean, jnp.float32(0.0))
        var = jnp.sum(d * d, axis=-1, keepdims=True) * inv_n
        f = d * lax.rsqrt(var + jnp.float32(eps))
        f = f * gamma_ref[...] + beta_ref[...]

    o_ref[...] = f.astype(o_ref.dtype)


def mlp_forward(x, params, *, n_h_layers, normalize_output=True,
                tile_m=512, eps=1e-5):
    """x: [N, in_feats] float32. params: dict of weights (see init below)."""
    N, in_feats = x.shape
    latent = params["w_in"].shape[1]
    out_feats = params["w_out"].shape[1]

    # Lane-dense padded feature dims.
    in_pad = _round_up(in_feats, _LANE)
    lat_pad = _round_up(latent, _LANE)
    out_pad = _round_up(out_feats, _LANE)

    # Batch tile: as large as requested but no bigger than the (rounded) batch;
    # keep >= 2 grid steps when possible so v7x's two TensorCores both work.
    tile_m = max(_SUBLANE,
                 min(_round_up(tile_m, _SUBLANE), _round_up(N, _SUBLANE)))
    n_pad = _round_up(N, tile_m)
    if n_pad // tile_m < 2 and tile_m > _SUBLANE:
        tile_m = max(_SUBLANE, _round_up(tile_m // 2, _SUBLANE))
        n_pad = _round_up(N, tile_m)
    grid_m = n_pad // tile_m

    # Zero-pad input and parameters (weights in bf16, biases/affine in f32).
    def pad2(a, rows, cols, dtype):
        a = jnp.asarray(a).reshape(a.shape[0] if a.ndim == 2 else 1, -1)
        return jnp.zeros((rows, cols), dtype).at[:a.shape[0], :a.shape[1]].set(
            a.astype(dtype))

    xp = jnp.zeros((n_pad, in_pad), jnp.float32).at[:N, :in_feats].set(x)
    w_in = pad2(params["w_in"], in_pad, lat_pad, jnp.bfloat16)
    b_in = pad2(params["b_in"], 1, lat_pad, jnp.float32)
    w_out = pad2(params["w_out"], lat_pad, out_pad, jnp.bfloat16)
    b_out = pad2(params["b_out"], 1, out_pad, jnp.float32)
    gamma = pad2(params["gamma"], 1, out_pad, jnp.float32)
    beta = pad2(params["beta"], 1, out_pad, jnp.float32)

    args = [xp, w_in, b_in]
    in_specs = [
        pl.BlockSpec((tile_m, in_pad), lambda i: (i, 0)),     # x (tiled rows)
        pl.BlockSpec((in_pad, lat_pad), lambda i: (0, 0)),    # w_in (resident)
        pl.BlockSpec((1, lat_pad), lambda i: (0, 0)),         # b_in
    ]
    if n_h_layers > 0:
        hw = jnp.zeros((n_h_layers, lat_pad, lat_pad), jnp.bfloat16)
        hw = hw.at[:, :latent, :latent].set(params["hw"].astype(jnp.bfloat16))
        hb = jnp.zeros((n_h_layers, lat_pad), jnp.float32)
        hb = hb.at[:, :latent].set(params["hb"].reshape(n_h_layers, -1))
        args += [hw, hb]
        in_specs += [
            pl.BlockSpec((n_h_layers, lat_pad, lat_pad), lambda i: (0, 0, 0)),
            pl.BlockSpec((n_h_layers, lat_pad), lambda i: (0, 0)),
        ]
    args += [w_out, b_out, gamma, beta]
    in_specs += [
        pl.BlockSpec((lat_pad, out_pad), lambda i: (0, 0)),   # w_out
        pl.BlockSpec((1, out_pad), lambda i: (0, 0)),         # b_out
        pl.BlockSpec((1, out_pad), lambda i: (0, 0)),         # gamma
        pl.BlockSpec((1, out_pad), lambda i: (0, 0)),         # beta
    ]

    # Advisory cost estimate for the XLA scheduler.
    flops = 2 * n_pad * (in_pad * lat_pad
                         + n_h_layers * lat_pad * lat_pad
                         + lat_pad * out_pad)
    transcendentals = n_pad * lat_pad * (1 + n_h_layers)      # erf per GELU elt
    bytes_accessed = (int(xp.size) * 4 + int(n_pad * out_pad) * 4
                      + sum(int(a.size) * a.dtype.itemsize for a in args[1:]))
    cost = pl.CostEstimate(flops=flops, transcendentals=transcendentals,
                           bytes_accessed=bytes_accessed)

    # Explicit VMEM budget with headroom; stays <= 64 MiB so it fits v7x too.
    weight_bytes = sum(int(a.size) * a.dtype.itemsize for a in args[1:])
    io_bytes = 2 * tile_m * (in_pad + out_pad) * 4            # double-buffered
    scratch_bytes = 6 * tile_m * lat_pad * 4                  # f32 temporaries
    vmem_limit = int(min(max(2 * weight_bytes + io_bytes + scratch_bytes
                             + (16 << 20), 32 << 20), 64 << 20))

    kernel = functools.partial(
        mlp_kernel, n_h_layers=n_h_layers, normalize_output=normalize_output,
        out_feats=out_feats, eps=eps)

    out = pl.pallas_call(
        kernel,
        out_shape=jax.ShapeDtypeStruct((n_pad, out_pad), jnp.float32),
        grid_spec=pltpu.PrefetchScalarGridSpec(
            num_scalar_prefetch=0,
            grid=(grid_m,),
            in_specs=in_specs,
            out_specs=pl.BlockSpec((tile_m, out_pad), lambda i: (i, 0)),
        ),
        compiler_params=pltpu.CompilerParams(
            dimension_semantics=("parallel",),
            vmem_limit_bytes=vmem_limit),
        cost_estimate=cost,
    )(*args)

    return out[:N, :out_feats]


def init_mlp_params(key, in_feats, out_feats, latent_space, n_h_layers):
    """Deterministic synthetic parameters (weights stored as (in, out))."""
    n_keys = 4 + 2 * max(n_h_layers, 1)
    ks = jax.random.split(key, n_keys)
    scale_in = 1.0 / jnp.sqrt(in_feats)
    scale_h = 1.0 / jnp.sqrt(latent_space)

    w_in = jax.random.uniform(ks[0], (in_feats, latent_space), jnp.float32,
                              -scale_in, scale_in)
    b_in = jax.random.uniform(ks[1], (1, latent_space), jnp.float32,
                              -scale_in, scale_in)
    hw_list, hb_list = [], []
    for i in range(max(n_h_layers, 1)):
        hw_list.append(jax.random.uniform(
            ks[2 + 2 * i], (latent_space, latent_space), jnp.float32,
            -scale_h, scale_h))
        hb_list.append(jax.random.uniform(
            ks[3 + 2 * i], (latent_space,), jnp.float32, -scale_h, scale_h))
    hw = jnp.stack(hw_list, axis=0)          # (n_h, L, L)
    hb = jnp.stack(hb_list, axis=0)          # (n_h, L)  -- flattened (no (1,L))

    w_out = jax.random.uniform(ks[-2], (latent_space, out_feats), jnp.float32,
                               -scale_h, scale_h)
    b_out = jax.random.uniform(ks[-1], (1, out_feats), jnp.float32,
                               -scale_h, scale_h)
    gamma = jnp.ones((1, out_feats), jnp.float32)   # LayerNorm affine defaults
    beta = jnp.zeros((1, out_feats), jnp.float32)
    return dict(w_in=w_in, b_in=b_in, hw=hw, hb=hb,
                w_out=w_out, b_out=b_out, gamma=gamma, beta=beta)


def mlp_reference(x, params, *, n_h_layers, normalize_output=True, eps=1e-5):
    """Pure-JAX reference with the same bf16-operand / f32-accum numerics."""
    def mm(a, w):
        return jnp.dot(a.astype(jnp.bfloat16), w.astype(jnp.bfloat16),
                       preferred_element_type=jnp.float32)

    f = _gelu_exact(mm(x, params["w_in"]) + params["b_in"])
    for i in range(n_h_layers):
        f = _gelu_exact(mm(f, params["hw"][i]) + params["hb"][i])
    f = mm(f, params["w_out"]) + params["b_out"]
    if normalize_output:
        mean = jnp.mean(f, axis=-1, keepdims=True)
        var = jnp.mean((f - mean) ** 2, axis=-1, keepdims=True)
        f = (f - mean) * lax.rsqrt(var + jnp.float32(eps))
        f = f * params["gamma"] + params["beta"]
    return f


if __name__ == "__main__":
    # Small deterministic example consistent with the module's forward:
    # MLP(in_feats=16, out_feats=16, latent_space=32, n_h_layers=2)
    in_feats, out_feats, latent_space, n_h_layers = 16, 16, 32, 2
    N = 50  # arbitrary row count (not tile-aligned) to exercise padding path

    key = jax.random.PRNGKey(0)
    kx, kp = jax.random.split(key)
    x = jax.random.normal(kx, (N, in_feats), jnp.float32)
    params = init_mlp_params(kp, in_feats, out_feats, latent_space, n_h_layers)

    out = mlp_forward(x, params, n_h_layers=n_h_layers, normalize_output=True)
    out = jax.block_until_ready(out)

    ref = mlp_reference(x, params, n_h_layers=n_h_layers, normalize_output=True)
    assert out.shape == (N, out_feats)
    err = float(jnp.max(jnp.abs(out - ref)))
    assert jnp.allclose(out, ref, atol=2e-3, rtol=2e-3), f"max abs err {err}"

    print("KERNEL_OK")
</pallas_src>

<mosaic_0001>
module attributes {stable_mosaic.version = 11 : i64} {
  func.func @mlp_kernel(%arg0: i32, %arg1: memref<32x128xf32, #tpu.memory_space<vmem>>, %arg2: memref<128x128xbf16, #tpu.memory_space<vmem>>, %arg3: memref<1x128xf32, #tpu.memory_space<vmem>>, %arg4: memref<2x128x128xbf16, #tpu.memory_space<vmem>>, %arg5: memref<2x128xf32, #tpu.memory_space<vmem>>, %arg6: memref<128x128xbf16, #tpu.memory_space<vmem>>, %arg7: memref<1x128xf32, #tpu.memory_space<vmem>>, %arg8: memref<1x128xf32, #tpu.memory_space<vmem>>, %arg9: memref<1x128xf32, #tpu.memory_space<vmem>>, %arg10: memref<32x128xf32, #tpu.memory_space<vmem>>) attributes {dimension_semantics = [#tpu.dimension_semantics<parallel>], iteration_bounds = array<i64: 2>, scalar_prefetch = 0 : i64, scratch_operands = 0 : i64, tpu.core_type = #tpu.core_type<tc>, window_params = [{transform_indices = @transform_0, window_bounds = array<i64: 32, 128>}, {pipeline_mode = #tpu.pipeline_mode<synchronous>, transform_indices = @transform_1, window_bounds = array<i64: 128, 128>}, {pipeline_mode = #tpu.pipeline_mode<synchronous>, transform_indices = @transform_2, window_bounds = array<i64: 1, 128>}, {pipeline_mode = #tpu.pipeline_mode<synchronous>, transform_indices = @transform_3, window_bounds = array<i64: 2, 128, 128>}, {pipeline_mode = #tpu.pipeline_mode<synchronous>, transform_indices = @transform_4, window_bounds = array<i64: 2, 128>}, {pipeline_mode = #tpu.pipeline_mode<synchronous>, transform_indices = @transform_5, window_bounds = array<i64: 128, 128>}, {pipeline_mode = #tpu.pipeline_mode<synchronous>, transform_indices = @transform_6, window_bounds = array<i64: 1, 128>}, {pipeline_mode = #tpu.pipeline_mode<synchronous>, transform_indices = @transform_7, window_bounds = array<i64: 1, 128>}, {pipeline_mode = #tpu.pipeline_mode<synchronous>, transform_indices = @transform_8, window_bounds = array<i64: 1, 128>}, {transform_indices = @transform_9, window_bounds = array<i64: 32, 128>}]} {
    %c0 = arith.constant 0 : index
    %c0_0 = arith.constant 0 : index
    %0 = vector.load %arg1[%c0, %c0_0] : memref<32x128xf32, #tpu.memory_space<vmem>>, vector<32x128xf32>
    %1 = arith.truncf %0 : vector<32x128xf32> to vector<32x128xbf16>
    %c0_1 = arith.constant 0 : index
    %c0_2 = arith.constant 0 : index
    %2 = vector.load %arg2[%c0_1, %c0_2] : memref<128x128xbf16, #tpu.memory_space<vmem>>, vector<128x128xbf16>
    %cst = arith.constant dense<0.000000e+00> : vector<32x128xf32>
    %3 = tpu.matmul %1, %2, %cst {dimension_numbers = #tpu.dot_dimension_numbers<[1], [0], [0], [1], [0, 0, 1, 1], [], []>} : vector<32x128xbf16>, vector<128x128xbf16>, vector<32x128xf32> -> vector<32x128xf32>
    %c0_3 = arith.constant 0 : index
    %c0_4 = arith.constant 0 : index
    %4 = vector.load %arg3[%c0_3, %c0_4] : memref<1x128xf32, #tpu.memory_space<vmem>>, vector<1x128xf32>
    %5 = vector.broadcast %4 : vector<1x128xf32> to vector<32x128xf32>
    %6 = arith.addf %3, %5 : vector<32x128xf32>
    %cst_5 = arith.constant 5.000000e-01 : f32
    %7 = vector.broadcast %cst_5 : f32 to vector<32x128xf32>
    %8 = arith.mulf %7, %6 : vector<32x128xf32>
    %cst_6 = arith.constant 0.707106769 : f32
    %9 = vector.broadcast %cst_6 : f32 to vector<32x128xf32>
    %10 = arith.mulf %6, %9 : vector<32x128xf32>
    %11 = math.erf %10 : vector<32x128xf32>
    %cst_7 = arith.constant 1.000000e+00 : f32
    %12 = vector.broadcast %cst_7 : f32 to vector<32x128xf32>
    %13 = arith.addf %12, %11 : vector<32x128xf32>
    %14 = arith.mulf %8, %13 : vector<32x128xf32>
    %c0_8 = arith.constant 0 : index
    %c0_9 = arith.constant 0 : index
    %15 = vector.load %arg5[%c0_8, %c0_9] : memref<2x128xf32, #tpu.memory_space<vmem>>, vector<2x128xf32>
    %c0_10 = arith.constant 0 : index
    %c0_11 = arith.constant 0 : index
    %c0_12 = arith.constant 0 : index
    %16 = vector.load %arg4[%c0_10, %c0_11, %c0_12] : memref<2x128x128xbf16, #tpu.memory_space<vmem>>, vector<1x128x128xbf16>
    %17 = vector.shape_cast %16 : vector<1x128x128xbf16> to vector<128x128xbf16>
    %18 = vector.extract_strided_slice %15 {offsets = [0, 0], sizes = [1, 128], strides = [1, 1]} : vector<2x128xf32> to vector<1x128xf32>
    %19 = arith.truncf %14 : vector<32x128xf32> to vector<32x128xbf16>
    %cst_13 = arith.constant dense<0.000000e+00> : vector<32x128xf32>
    %20 = tpu.matmul %19, %17, %cst_13 {dimension_numbers = #tpu.dot_dimension_numbers<[1], [0], [0], [1], [0, 0, 1, 1], [], []>} : vector<32x128xbf16>, vector<128x128xbf16>, vector<32x128xf32> -> vector<32x128xf32>
    %21 = vector.broadcast %18 : vector<1x128xf32> to vector<32x128xf32>
    %22 = arith.addf %20, %21 : vector<32x128xf32>
    %cst_14 = arith.constant 5.000000e-01 : f32
    %23 = vector.broadcast %cst_14 : f32 to vector<32x128xf32>
    %24 = arith.mulf %23, %22 : vector<32x128xf32>
    %cst_15 = arith.constant 0.707106769 : f32
    %25 = vector.broadcast %cst_15 : f32 to vector<32x128xf32>
    %26 = arith.mulf %22, %25 : vector<32x128xf32>
    %27 = math.erf %26 : vector<32x128xf32>
    %cst_16 = arith.constant 1.000000e+00 : f32
    %28 = vector.broadcast %cst_16 : f32 to vector<32x128xf32>
    %29 = arith.addf %28, %27 : vector<32x128xf32>
    %30 = arith.mulf %24, %29 : vector<32x128xf32>
    %c1 = arith.constant 1 : index
    %c0_17 = arith.constant 0 : index
    %c0_18 = arith.constant 0 : index
    %31 = vector.load %arg4[%c1, %c0_17, %c0_18] : memref<2x128x128xbf16, #tpu.memory_space<vmem>>, vector<1x128x128xbf16>
    %32 = vector.shape_cast %31 : vector<1x128x128xbf16> to vector<128x128xbf16>
    %33 = vector.extract_strided_slice %15 {offsets = [1, 0], sizes = [1, 128], strides = [1, 1]} : vector<2x128xf32> to vector<1x128xf32>
    %34 = arith.truncf %30 : vector<32x128xf32> to vector<32x128xbf16>
    %cst_19 = arith.constant dense<0.000000e+00> : vector<32x128xf32>
    %35 = tpu.matmul %34, %32, %cst_19 {dimension_numbers = #tpu.dot_dimension_numbers<[1], [0], [0], [1], [0, 0, 1, 1], [], []>} : vector<32x128xbf16>, vector<128x128xbf16>, vector<32x128xf32> -> vector<32x128xf32>
    %36 = vector.broadcast %33 : vector<1x128xf32> to vector<32x128xf32>
    %37 = arith.addf %35, %36 : vector<32x128xf32>
    %cst_20 = arith.constant 5.000000e-01 : f32
    %38 = vector.broadcast %cst_20 : f32 to vector<32x128xf32>
    %39 = arith.mulf %38, %37 : vector<32x128xf32>
    %cst_21 = arith.constant 0.707106769 : f32
    %40 = vector.broadcast %cst_21 : f32 to vector<32x128xf32>
    %41 = arith.mulf %37, %40 : vector<32x128xf32>
    %42 = math.erf %41 : vector<32x128xf32>
    %cst_22 = arith.constant 1.000000e+00 : f32
    %43 = vector.broadcast %cst_22 : f32 to vector<32x128xf32>
    %44 = arith.addf %43, %42 : vector<32x128xf32>
    %45 = arith.mulf %39, %44 : vector<32x128xf32>
    %46 = arith.truncf %45 : vector<32x128xf32> to vector<32x128xbf16>
    %c0_23 = arith.constant 0 : index
    %c0_24 = arith.constant 0 : index
    %47 = vector.load %arg6[%c0_23, %c0_24] : memref<128x128xbf16, #tpu.memory_space<vmem>>, vector<128x128xbf16>
    %cst_25 = arith.constant dense<0.000000e+00> : vector<32x128xf32>
    %48 = tpu.matmul %46, %47, %cst_25 {dimension_numbers = #tpu.dot_dimension_numbers<[1], [0], [0], [1], [0, 0, 1, 1], [], []>} : vector<32x128xbf16>, vector<128x128xbf16>, vector<32x128xf32> -> vector<32x128xf32>
    %c0_26 = arith.constant 0 : index
    %c0_27 = arith.constant 0 : index
    %49 = vector.load %arg7[%c0_26, %c0_27] : memref<1x128xf32, #tpu.memory_space<vmem>>, vector<1x128xf32>
    %50 = vector.broadcast %49 : vector<1x128xf32> to vector<32x128xf32>
    %51 = arith.addf %48, %50 : vector<32x128xf32>
    %52 = tpu.iota {dimensions = array<i32: 1>} : vector<1x128xi32>
    %c16_i32 = arith.constant 16 : i32
    %53 = vector.broadcast %c16_i32 : i32 to vector<1x128xi32>
    %54 = arith.cmpi slt, %52, %53 : vector<1x128xi32>
    %cst_28 = arith.constant dense<0.000000e+00> : vector<32xf32>
    %55 = vector.multi_reduction <add>, %51, %cst_28 [1] : vector<32x128xf32> to vector<32xf32>
    %56 = vector.shape_cast %55 : vector<32xf32> to vector<32x1xf32>
    %cst_29 = arith.constant 6.250000e-02 : f32
    %57 = vector.broadcast %cst_29 : f32 to vector<32x1xf32>
    %58 = arith.mulf %56, %57 : vector<32x1xf32>
    %59 = vector.broadcast %58 : vector<32x1xf32> to vector<32x128xf32>
    %60 = arith.subf %51, %59 : vector<32x128xf32>
    %cst_30 = arith.constant 0.000000e+00 : f32
    %61 = vector.shape_cast %54 : vector<1x128xi1> to vector<1x128xi1>
    %62 = vector.broadcast %61 : vector<1x128xi1> to vector<32x128xi1>
    %63 = vector.broadcast %cst_30 : f32 to vector<32x128xf32>
    %64 = arith.select %62, %60, %63 : vector<32x128xi1>, vector<32x128xf32>
    %65 = arith.mulf %64, %64 : vector<32x128xf32>
    %cst_31 = arith.constant dense<0.000000e+00> : vector<32xf32>
    %66 = vector.multi_reduction <add>, %65, %cst_31 [1] : vector<32x128xf32> to vector<32xf32>
    %67 = vector.shape_cast %66 : vector<32xf32> to vector<32x1xf32>
    %cst_32 = arith.constant 6.250000e-02 : f32
    %68 = vector.broadcast %cst_32 : f32 to vector<32x1xf32>
    %69 = arith.mulf %67, %68 : vector<32x1xf32>
    %cst_33 = arith.constant 9.99999974E-6 : f32
    %70 = vector.broadcast %cst_33 : f32 to vector<32x1xf32>
    %71 = arith.addf %69, %70 : vector<32x1xf32>
    %72 = math.rsqrt %71 : vector<32x1xf32>
    %73 = vector.broadcast %72 : vector<32x1xf32> to vector<32x128xf32>
    %74 = arith.mulf %64, %73 : vector<32x128xf32>
    %c0_34 = arith.constant 0 : index
    %c0_35 = arith.constant 0 : index
    %75 = vector.load %arg8[%c0_34, %c0_35] : memref<1x128xf32, #tpu.memory_space<vmem>>, vector<1x128xf32>
    %76 = vector.broadcast %75 : vector<1x128xf32> to vector<32x128xf32>
    %77 = arith.mulf %74, %76 : vector<32x128xf32>
    %c0_36 = arith.constant 0 : index
    %c0_37 = arith.constant 0 : index
    %78 = vector.load %arg9[%c0_36, %c0_37] : memref<1x128xf32, #tpu.memory_space<vmem>>, vector<1x128xf32>
    %79 = vector.broadcast %78 : vector<1x128xf32> to vector<32x128xf32>
    %80 = arith.addf %77, %79 : vector<32x128xf32>
    %c0_38 = arith.constant 0 : index
    %c0_39 = arith.constant 0 : index
    %81 = vector.load %arg10[%c0_38, %c0_39] : memref<32x128xf32, #tpu.memory_space<vmem>>, vector<32x128xf32>
    tpu.vector_store %arg10[%c0_38, %c0_39], %80 {strides = array<i32>} : memref<32x128xf32, #tpu.memory_space<vmem>>, vector<32x128xf32>,
    return
  }
  func.func @transform_0(%arg0: i32) -> (i32, i32) {
    %c0_i32 = arith.constant 0 : i32
    %c0_i32_0 = arith.constant 0 : i32
    return %arg0, %c0_i32 : i32, i32
  }
  func.func @transform_1(%arg0: i32) -> (i32, i32) {
    %c0_i32 = arith.constant 0 : i32
    %c0_i32_0 = arith.constant 0 : i32
    %c0_i32_1 = arith.constant 0 : i32
    return %c0_i32, %c0_i32_0 : i32, i32
  }
  func.func @transform_2(%arg0: i32) -> (i32, i32) {
    %c0_i32 = arith.constant 0 : i32
    %c0_i32_0 = arith.constant 0 : i32
    %c0_i32_1 = arith.constant 0 : i32
    return %c0_i32, %c0_i32_0 : i32, i32
  }
  func.func @transform_3(%arg0: i32) -> (i32, i32, i32) {
    %c0_i32 = arith.constant 0 : i32
    %c0_i32_0 = arith.constant 0 : i32
    %c0_i32_1 = arith.constant 0 : i32
    %c0_i32_2 = arith.constant 0 : i32
    return %c0_i32, %c0_i32_0, %c0_i32_1 : i32, i32, i32
  }
  func.func @transform_4(%arg0: i32) -> (i32, i32) {
    %c0_i32 = arith.constant 0 : i32
    %c0_i32_0 = arith.constant 0 : i32
    %c0_i32_1 = arith.constant 0 : i32
    return %c0_i32, %c0_i32_0 : i32, i32
  }
  func.func @transform_5(%arg0: i32) -> (i32, i32) {
    %c0_i32 = arith.constant 0 : i32
    %c0_i32_0 = arith.constant 0 : i32
    %c0_i32_1 = arith.constant 0 : i32
    return %c0_i32, %c0_i32_0 : i32, i32
  }
  func.func @transform_6(%arg0: i32) -> (i32, i32) {
    %c0_i32 = arith.constant 0 : i32
    %c0_i32_0 = arith.constant 0 : i32
    %c0_i32_1 = arith.constant 0 : i32
    return %c0_i32, %c0_i32_0 : i32, i32
  }
  func.func @transform_7(%arg0: i32) -> (i32, i32) {
    %c0_i32 = arith.constant 0 : i32
    %c0_i32_0 = arith.constant 0 : i32
    %c0_i32_1 = arith.constant 0 : i32
    return %c0_i32, %c0_i32_0 : i32, i32
  }
  func.func @transform_8(%arg0: i32) -> (i32, i32) {
    %c0_i32 = arith.constant 0 : i32
    %c0_i32_0 = arith.constant 0 : i32
    %c0_i32_1 = arith.constant 0 : i32
    return %c0_i32, %c0_i32_0 : i32, i32
  }
  func.func @transform_9(%arg0: i32) -> (i32, i32) {
    %c0_i32 = arith.constant 0 : i32
    %c0_i32_0 = arith.constant 0 : i32
    return %arg0, %c0_i32 : i32, i32
  }
}

</mosaic_0001>

<bundles_post_ra>
// kernel: tpu_custom_call.1
= control target key start
LH: loop header
LB: loop body
LE: loop exit
PB: predicated region body
PF: predicated region fallthrough
CT: control target
= control target key end

     0   :  { %s2016_s0 = inlined_call_operand.hbm [shape: f32[64,128], index: 0, kind: input, shape index: {}]   ;;  %s2017_s1 = inlined_call_operand.hbm [shape: bf16[128,128], index: 1, kind: input, shape index: {}]   ;;  %s2018_s2 = inlined_call_operand.vmem [shape: f32[1,128], index: 2, kind: input, shape index: {}]   ;;  %s2019_s3 = inlined_call_operand.hbm [shape: bf16[2,128,128], index: 3, kind: input, shape index: {}]   ;;  %s2020_s4 = inlined_call_operand.vmem [shape: f32[2,128], index: 4, kind: input, shape index: {}]   ;;  %s2021_s5 = inlined_call_operand.hbm [shape: bf16[128,128], index: 5, kind: input, shape index: {}]   ;;  %s2022_s6 = inlined_call_operand.vmem [shape: f32[1,128], index: 6, kind: input, shape index: {}]   ;;  %s2023_s7 = inlined_call_operand.vmem [shape: f32[1,128], index: 7, kind: input, shape index: {}]   ;;  %s2024_s8 = inlined_call_operand.vmem [shape: f32[1,128], index: 8, kind: input, shape index: {}]   ;;  %s2025_s9 = inlined_call_operand.hbm [shape: f32[64,128], index: 9, kind: output, shape index: {}]  }
   0x1   :  { %2032 = sst [smem:[#allocation17_spill]] %s2025_s9 }
   0x2   :  { %14 = vsyncpa [#allocation3], 0 }
   0x3   :  { %16 = vsyncpa [#allocation3 + $0x1], 0 }
   0x4   :  { %17 = vsyncpa [#allocation6], 0 }
   0x5   :  { %18 = vsyncpa [#allocation9], 0 }
   0x6   :  { %19 = vsyncpa [#allocation4], 0 }
   0x7   :  { %21 = vsyncpa [#allocation4 + $0x1], 0  ;;  %s1717_s30 = smov 0   ;;  %s1719_s10 = smov 0  }
   0x8   :  { %s1721_s11 = smov 0   ;;  %s1723_s12 = smov 0  }
   0x9 LB: > { %2033 = sst [smem:[#allocation15_spill]] %s1642_s30  ;;  %s1738_s13 = sadd.s32 4294967295, %s1654_s12   ;;  %s1654_s12 = sphi %s1723_s12, %s2057_s12   ;;  %s1650_s11 = sphi %s1721_s11, %s2056_s11   ;;  %s1646_s10 = sphi %s1719_s10, %s2055_s10   ;;  %s1642_s30 = sphi %s1717_s30, %s2054_s30  }
   0xa   : > { %s1141_s14 = sadd.s32 4294967294, %s1654_s12   ;;  %p47_p0 = scmp.ne.s32.totalorder %s1646_s10, %s1642_s30 }
   0xb   : > { %p2026_p1 = scmp.eq.s32.totalorder %s1738_s13, 0  ;;  %p245_p3 = scmp.eq.s32.totalorder %s1141_s14, 1 }
   0xc   : > { %p1142_p5 = scmp.ge.s32.totalorder %s1654_s12, 1  ;;  %p252_p7 = scmp.lt.s32.totalorder %s1654_s12, 3 }
   0xd   : > { %p1747_p4 = por %p2026_p1, %p47_p0  ;;  %p1752_p6 = por %p245_p3, %p47_p0 }
   0xe   : > { %p1757_p8 = pnand %p1142_p5, %p252_p7  ;;  %s1656_s18 = smov [#allocation5]  }
   0xf   : > { %s2034_s15 = scalar_select %p1747_p4, 1, 0 }
  0x10   : > { %s2035_s16 = scalar_select %p1752_p6, 1, 0 }
  0x11   : > { %s2037_s17 = scalar_select %p1757_p8, 1, 0 }
  0x12   : > { %2036 = sst [smem:[#allocation16_spill]] %s2035_s16  ;;  %s264_s19 = sshll.u32 %s1656_s18, 4  ;;  %s1761_s19 = int_to_ptr.vmem [resolvable:$true] %s264_s19 }
  0x13   : > { %p1335_p9 = pneg %p1757_p8  ;;  %s1657_s21 = smov [#allocation7]  }
  0x14   : > { %s280_s22 = sshll.u32 %s1657_s21, 4  ;;  %s1658_s23 = smov [#allocation8]   ;;  %s1772_s22 = int_to_ptr.vmem [resolvable:$true] %s280_s22 }
  0x15   : > { %p1768_p11 = pnand %p1335_p9, %p2026_p1  ;;  %s1774_s24 = sshll.u32 %s1658_s23, 4  ;;  %s297_s24 = int_to_ptr.vmem [resolvable:$true] %s1774_s24 }
  0x16   : > { %s1466_s27 = scalar_lea.hbm %s2017_s1, 1024 }
  0x17   : > { %p1467_p12 = scmp.ne.s32.totalorder %s2017_s1, %s1466_s27  ;;  %p1784_p13 = pneg %p1768_p11 }
  0x18   : > { %p1473_p5 = scmp.lt.u32.totalorder %s1466_s27, %s2017_s1 }
  0x19   : > { %p1469_p0 = pnand %p1784_p13, %p1467_p12 }
  0x1b   : > { %p1470_p3 = pneg %p1469_p0 }
  0x1d   : > { %p1475_p7 = pnand %p1473_p5, %p1470_p3 }
  0x1f   : > { %1478 = shalt.err (!%p1475_p7)
}
  0x20   : > { %s1479_s23 = scalar_lea.vmem %s1761_s19, 1024  ;;  %p1487_p2 = scmp.lt.s32.totalorder %s1761_s19, %s1761_s19 }
  0x21   : > { %p1480_p9 = scmp.ne.s32.totalorder %s1761_s19, %s1479_s23  ;;  %p1488_p6 = scmp.lt.s32.totalorder %s1479_s23, %s1479_s23 }
  0x23   : > { %p1482_p10 = pnand %p1480_p9, %p1784_p13  ;;  %p1489_p12 = por %p1488_p6, %p1487_p2 }
  0x25   : > { %p1483_p1 = pneg %p1482_p10 }
  0x27   : > { %p1490_p0 = pnand %p1489_p12, %p1483_p1 }
  0x29   : > { %1493 = shalt.err (!%p1490_p0)
}
  0x2a   : > { %s1659_s25 = smov 64   ;;  %s1660_s26 = smov 4  }
  0x2b   : > { %1338 = dma.hbm_to_vmem [thread:$0]  (!%p1768_p11), %s2017_s1, 1024, %s1761_s19, [#allocation6], %s1659_s25, %s1659_s25, %s1660_s26  }
  0x2c   : > { %s1494_s21 = scalar_lea.hbm %s2019_s3, 2048 }
  0x2d   : > { %p1495_p1 = scmp.ne.s32.totalorder %s2019_s3, %s1494_s21  ;;  %p1501_p10 = scmp.lt.u32.totalorder %s1494_s21, %s2019_s3 }
  0x2f   : > { %p1497_p2 = pnand %p1495_p1, %p1784_p13 }
  0x31   : > { %p1498_p6 = pneg %p1497_p2 }
  0x33   : > { %p1503_p3 = pnand %p1501_p10, %p1498_p6 }
  0x35   : > { %1506 = shalt.err (!%p1503_p3)
}
  0x36   : > { %s1507_s19 = scalar_lea.vmem %s1772_s22, 2048  ;;  %p1515_p12 = scmp.lt.s32.totalorder %s1772_s22, %s1772_s22 }
  0x37   : > { %p1508_p5 = scmp.ne.s32.totalorder %s1772_s22, %s1507_s19  ;;  %p1516_p0 = scmp.lt.s32.totalorder %s1507_s19, %s1507_s19 }
  0x39   : > { %p1510_p7 = pnand %p1508_p5, %p1784_p13  ;;  %p1517_p1 = por %p1516_p0, %p1515_p12 }
  0x3b   : > { %p1511_p9 = pneg %p1510_p7 }
  0x3d   : > { %p1518_p2 = pnand %p1517_p1, %p1511_p9 }
  0x3f   : > { %1521 = shalt.err (!%p1518_p2)
}
  0x40   : > { %1341 = dma.hbm_to_vmem [thread:$0]  (!%p1768_p11), %s2019_s3, 2048, %s1772_s22, [#allocation6], %s1659_s25, %s1659_s25, %s1660_s26  }
  0x41   : > { %s1522_s28 = scalar_lea.hbm %s2021_s5, 1024 }
  0x42   : > { %p1523_p6 = scmp.ne.s32.totalorder %s2021_s5, %s1522_s28  ;;  %p1529_p5 = scmp.lt.u32.totalorder %s1522_s28, %s2021_s5 }
  0x44   : > { %p1525_p10 = pnand %p1523_p6, %p1784_p13 }
  0x46   : > { %p1526_p3 = pneg %p1525_p10 }
  0x48   : > { %p1531_p7 = pnand %p1529_p5, %p1526_p3 }
  0x4a   : > { %1534 = shalt.err (!%p1531_p7)
}
  0x4b   : > { %s1535_s19 = scalar_lea.vmem %s297_s24, 1024  ;;  %p1543_p1 = scmp.lt.s32.totalorder %s297_s24, %s297_s24 }
  0x4c   : > { %p1536_p9 = scmp.ne.s32.totalorder %s297_s24, %s1535_s19  ;;  %p1544_p2 = scmp.lt.s32.totalorder %s1535_s19, %s1535_s19 }
  0x4e   : > { %p1538_p12 = pnand %p1536_p9, %p1784_p13  ;;  %p1545_p4 = por %p1544_p2, %p1543_p1 }
  0x50   : > { %p1539_p0 = pneg %p1538_p12 }
  0x52   : > { %p1546_p8 = pnand %p1545_p4, %p1539_p0 }
  0x54   : > { %1549 = shalt.err (!%p1546_p8)
}
  0x55   : > { %1344 = dma.hbm_to_vmem [thread:$0]  (!%p1768_p11), %s2021_s5, 1024, %s297_s24, [#allocation9], %s1659_s25, %s1659_s25, %s1660_s26  }
  0x56   : > { %s1857_s14 = sadd.s32 1, %s1654_s12   ;;  %s34_s30 = sadd.s32 1, %s1650_s11 }
  0x57   : > { %s31_s20 = ssub.s32 %s1654_s12, %s1857_s14  ;;  %p41_p8 = scmp.ne.s32.totalorder %s1650_s11, %s1646_s10 }
  0x58   : > { %p32_p4 = scmp.eq.s32.totalorder %s31_s20, 0  ;;  %p42_p13 = scmp.eq.s32.totalorder %s1654_s12, 0 }
  0x59   : > { %p1356_p6 = scmp.lt.s32.totalorder %s1654_s12, 2  ;;  %p2040_p3 = scmp.eq.s32.totalorder %s1738_s13, 1 }
  0x5a   : > { %s1867_s16 = scalar_select %p32_p4, %s1650_s11, %s34_s30  }
  0x5b   : > { %p43_p10 = por %p42_p13, %p41_p8  ;;  %p1871_p5 = por %p2040_p3, %p41_p8 }
  0x5c   : > { %s319_s28 = sand.u32 1, %s1650_s11   ;;  %s1197_s29 = sshll.u32 %s1654_s12, 9 }
  0x5d   : > { %s1147_s24 = sshll.u32 %s319_s28, 5  ;;  %s1880_s18 = scalar_lea.hbm %s2016_s0, %s1197_s29 }
  0x5e   : > { %s323_s21 = scalar_lea.vmem [#allocation2], %s1147_s24  ;;  %p1882_p11 = pnand %p1356_p6, %p43_p10 }
  0x5f   : > { %s330_s23 = sshll.u32 %s323_s21, 4  ;;  %s1888_s22 = scalar_lea.sflag [#allocation3], %s319_s28  ;;  %s1886_s23 = int_to_ptr.vmem [resolvable:$true] %s330_s23 }
  0x60   : > { %s1550_s9 = scalar_lea.hbm %s1880_s18, 512  ;;  %p1552_p9 = pneg %p1882_p11 }
  0x61   : > { %p1551_p7 = scmp.ne.s32.totalorder %s1880_s18, %s1550_s9  ;;  %s1555_s29 = scalar_lea.hbm %s2016_s0, 1024 }
  0x62   : > { %p1556_p1 = scmp.lt.u32.totalorder %s1880_s18, %s2016_s0  ;;  %p1557_p2 = scmp.lt.u32.totalorder %s1555_s29, %s1550_s9 }
  0x63   : > { %p1553_p12 = pnand %p1552_p9, %p1551_p7  ;;  %p1559_p8 = scmp.lt.u32.totalorder %s1550_s9, %s1880_s18 }
  0x64   : > { %p1558_p4 = por %p1557_p2, %p1556_p1 }
  0x65   : > { %p1554_p0 = pneg %p1553_p12 }
  0x66   : > { %p1560_p13 = por %p1559_p8, %p1558_p4 }
  0x68   : > { %p1561_p6 = pnand %p1560_p13, %p1554_p0 }
  0x6a   : > { %1564 = shalt.err (!%p1561_p6)
}
  0x6b   : > { %s1565_s28 = scalar_lea.vmem %s1886_s23, 512  ;;  %s1661_s26 = smov [#allocation2]  }
  0x6c   : > { %p1566_p10 = scmp.ne.s32.totalorder %s1886_s23, %s1565_s28  ;;  %s1570_s21 = sshll.u32 %s1661_s26, 4  ;;  %s1571_s21 = int_to_ptr.vmem [resolvable:$false] %s1570_s21 }
  0x6d   : > { %s1572_s20 = scalar_lea.vmem %s1571_s21, 1024  ;;  %p1573_p12 = scmp.lt.s32.totalorder %s1886_s23, %s1571_s21 }
  0x6e   : > { %p1568_p3 = pnand %p1566_p10, %p1552_p9  ;;  %p1574_p1 = scmp.lt.s32.totalorder %s1572_s20, %s1565_s28 }
  0x70   : > { %p1569_p7 = pneg %p1568_p3  ;;  %p1575_p2 = por %p1574_p1, %p1573_p12 }
  0x72   : > { %p1576_p4 = pnand %p1575_p2, %p1569_p7 }
  0x74   : > { %1579 = shalt.err (!%p1576_p4)
}
  0x75   : > { %s1662_s9 = smov 128   ;;  %s1663_s30 = smov 8  }
  0x76   : > { %1348 = dma.hbm_to_vmem [thread:$0]  (!%p1882_p11), %s1880_s18, 512, %s1886_s23, %s1888_s22, %s1662_s9, %s1662_s9, %s1663_s30  }
  0x77   : > { %p2043_p9 = scmp.ne.s32.totalorder %s2037_s17, 0 }
  0x78   : > { %s1919_s29 = sand.u32 (!%p2043_p9), 1, %s1646_s10   ;;  %p2044_p0 = scmp.ne.s32.totalorder (!%p2043_p9), %s2034_s15, 0 }
  0x79   : > { %342 = sbr.rel (%p2043_p9) target bundleno = 1430 (0x596), region = 56  ;;  %s1151_s24 = sshll.u32 (!%p2043_p9), %s1919_s29, 5 }
  0x7a   : > { %s345_s25 = scalar_lea.sflag (!%p2043_p9), [#allocation3], %s1919_s29  ;;  %s1925_s28 = scalar_lea.vmem (!%p2043_p9), [#allocation2], %s1151_s24 }
  0x80   : > { %1625 = dma.done.wait (%p2044_p0), %s345_s25, 512  }
  0x81   : > { %1627 = vsyncadd (%p2044_p0), %s345_s25, 4294966784  ;;  %p2045_p11 = scmp.eq.s32.totalorder %s1738_s13, 0 }
  0x83   : > { %1629 = dma.done.wait (%p2045_p11), [#allocation6], 3072   ;;  %p2046_p8 = pmov %p2045_p11 }
  0x85   : > { %1631 = vsyncadd (%p2046_p8), [#allocation6], 4294964224  ;;  %p2047_p13 = pmov %p2046_p8 }
  0x86   : > { %p2048_p6 = pmov %p2046_p8 }
  0x87   : > { %1633 = dma.done.wait (%p2047_p13), [#allocation9], 1024  }
  0x88   : > { %1635 = vsyncadd (%p2048_p6), [#allocation9], 4294966272  ;;  %v1402_v0 = vld [vmem:[#allocation5] sm:$0xff]   ;;  %v1403_v1 = vld [vmem:[#allocation5 + $0x8] sm:$0xff]   ;;  %v563_v63 = vlaneseq  ;;  %s394_s30 = scalar_lea.vmem [#allocation10], %s1151_s24  ;;  %s1198_s25 = sshll.u32 %s1738_s13, 9 }
  0x89   : > { %1239 = vmatprep.subr.bf16.mxu0 %v1402_v0  ;;  %v1404_v2 = vld [vmem:[#allocation5 + $0x10] sm:$0xff]   ;;  %v1405_v3 = vld [vmem:[#allocation5 + $0x18] sm:$0xff]   ;;  %v398_v4 = vld [vmem:[%s1925_s28] sm:$0xff]  ;;  %s2049_s18 = sld [smem:[#allocation17_spill]]  ;;  %s1026_s24 = scalar_lea.sflag [#allocation4], %s1919_s29 }
  0x8a   : > { %1240 = vmatpush3.bf16.msra.mxu0 %v1402_v0  ;;  %v399_v5 = vld [vmem:[%s1925_s28 + $0x8] sm:$0xff]  ;;  %v1406_v7 = vld [vmem:[#allocation5 + $0x20] sm:$0xff]   ;;  %v1408_v11 = vld [vmem:[#allocation5 + $0x30] sm:$0xff]   ;;  %v564_v0 = vshrl.u32 %v563_v63, 7  ;;  %s1664_s13 = smov [#allocation10]  }
  0x8b   : > { %1241 = vmatprep.subr.bf16.mxu0 %v1403_v1  ;;  %v402_v6 = vpack.c.bf16 %v399_v5, %v398_v4  ;;  %v1410_v8 = vld [vmem:[#allocation7] sm:$0xff]   ;;  %v1411_v9 = vld [vmem:[#allocation7 + $0x8] sm:$0xff]   ;;  %v1409_v12 = vld [vmem:[#allocation5 + $0x38] sm:$0xff]   ;;  %s1584_s22 = sshll.u32 %s1664_s13, 4  ;;  %s1585_s22 = int_to_ptr.vmem [resolvable:$false] %s1584_s22 }
  0x8c   : > { %1259 = vmatprep.subr.bf16.mxu1 %v1410_v8  ;;  %v1407_v10 = vld [vmem:[#allocation5 + $0x28] sm:$0xff]   ;;  %v400_v13 = vld [vmem:[%s1925_s28 + $0x10] sm:$0xff]  ;;  %v401_v14 = vld [vmem:[%s1925_s28 + $0x18] sm:$0xff]  ;;  %s1039_s28 = sshll.u32 %s394_s30, 4  ;;  %s1586_s26 = scalar_lea.vmem %s1585_s22, 1024  ;;  %s1972_s28 = int_to_ptr.vmem [resolvable:$true] %s1039_s28 }
  0x8d   : > { %1255 = vmatprep.mubr.bf16.mxu0 %v402_v6  ;;  %1260 = vmatpush3.bf16.msra.mxu1 %v1410_v8  ;;  %v403_v15 = vpack.c.bf16 %v401_v14, %v400_v13  ;;  %v1412_v16 = vld [vmem:[#allocation7 + $0x10] sm:$0xff]   ;;  %v1413_v17 = vld [vmem:[#allocation7 + $0x18] sm:$0xff]   ;;  %v1414_v18 = vld [vmem:[#allocation7 + $0x20] sm:$0xff]   ;;  %s1580_s19 = scalar_lea.vmem %s1972_s28, 512  ;;  %p1587_p12 = scmp.lt.s32.totalorder %s1972_s28, %s1585_s22 }
  0x8e   : > { %1242 = vmatpush3.bf16.msra.mxu0 %v1403_v1  ;;  %1261 = vmatprep.subr.bf16.mxu1 %v1411_v9  ;;  %v1415_v19 = vld [vmem:[#allocation7 + $0x28] sm:$0xff]   ;;  %v1416_v20 = vld [vmem:[#allocation7 + $0x30] sm:$0xff]   ;;  %v1417_v21 = vld [vmem:[#allocation7 + $0x38] sm:$0xff]   ;;  %v565_v1 = vsub.s32 0, %v564_v0  ;;  %p1581_p10 = scmp.ne.s32.totalorder %s1972_s28, %s1580_s19  ;;  %p1588_p1 = scmp.lt.s32.totalorder %s1586_s26, %s1580_s19 }
  0x8f   : > { %1243 = vmatprep.subr.bf16.mxu0 %v1404_v2  ;;  %v1418_v22 = vld [vmem:[#allocation7 + $0x40] sm:$0xff]   ;;  %v1419_v23 = vld [vmem:[#allocation7 + $0x48] sm:$0xff]   ;;  %v1420_v55 = vld [vmem:[#allocation7 + $0x50] sm:$0xff]   ;;  %s1970_s23 = scalar_lea.hbm %s2049_s18, %s1198_s25 }
  0x90   : > { %v1156_v24 = vld [vmem:[%s2018_s2] ss:$0 sm:$0xff]  ;;  %v1421_v56 = vld [vmem:[#allocation7 + $0x58] sm:$0xff]   ;;  %v1423_v58 = vld [vmem:[#allocation7 + $0x68] sm:$0xff]   ;;  %p1582_p3 = pnand %p1581_p10, %p1871_p5  ;;  %p1589_p2 = por %p1588_p1, %p1587_p12 }
  0x91   : > { %1262 = vmatpush3.bf16.msra.mxu1 %v1411_v9  ;;  %v1422_v57 = vld [vmem:[#allocation7 + $0x60] sm:$0xff]   ;;  %v1424_v59 = vld [vmem:[#allocation7 + $0x70] sm:$0xff]   ;;  %v1425_v60 = vld [vmem:[#allocation7 + $0x78] sm:$0xff]  }
  0x92   : > { %1244 = vmatpush3.bf16.msra.mxu0 %v1404_v2  ;;  %1263 = vmatprep.subr.bf16.mxu1 %v1412_v16  ;;  %v1426_v61 = vld [vmem:[#allocation8] sm:$0xff]   ;;  %v1427_v62 = vld [vmem:[#allocation8 + $0x8] sm:$0xff]   ;;  %p1583_p7 = pneg %p1582_p3 }
  0x93   : > { %1245 = vmatprep.subr.bf16.mxu0 %v1405_v3  ;;  %v544_v2 = vld [vmem:[%s2020_s4] sm:$0x3] }
  0x94   : > { %p1590_p4 = pnand %p1589_p2, %p1583_p7 }
  0x95   : > { %1264 = vmatpush3.bf16.msra.mxu1 %v1412_v16 }
  0x96   : > { %1246 = vmatpush3.bf16.msra.mxu0 %v1405_v3  ;;  %1265 = vmatprep.subr.bf16.mxu1 %v1413_v17  ;;  %v566_v3 = vrot.slane %v544_v2, %v565_v1 }
  0x97   : > { %1247 = vmatprep.subr.bf16.mxu0 %v1406_v7 }
  0x99   : > { %1266 = vmatpush3.bf16.msra.mxu1 %v1413_v17 }
  0x9a   : > { %1248 = vmatpush3.bf16.msra.mxu0 %v1406_v7  ;;  %1267 = vmatprep.subr.bf16.mxu1 %v1414_v18 }
  0x9b   : > { %1249 = vmatprep.subr.bf16.mxu0 %v1407_v10 }
  0x9d   : > { %1268 = vmatpush3.bf16.msra.mxu1 %v1414_v18 }
  0x9e   : > { %1250 = vmatpush3.bf16.msra.mxu0 %v1407_v10  ;;  %1269 = vmatprep.subr.bf16.mxu1 %v1415_v19 }
  0x9f   : > { %1251 = vmatprep.subr.bf16.mxu0 %v1408_v11 }
  0xa1   : > { %1270 = vmatpush3.bf16.msra.mxu1 %v1415_v19 }
  0xa2   : > { %1252 = vmatpush3.bf16.msra.mxu0 %v1408_v11  ;;  %1271 = vmatprep.subr.bf16.mxu1 %v1416_v20 }
  0xa3   : > { %1253 = vmatprep.subr.bf16.mxu0 %v1409_v12 }
  0xa5   : > { %1272 = vmatpush3.bf16.msra.mxu1 %v1416_v20 }
  0xa6   : > { %1254 = vmatpush3.bf16.msra.mxu0 %v1409_v12  ;;  %1273 = vmatprep.subr.bf16.mxu1 %v1417_v21 }
  0xa7   : > { %1279 = vmatprep.subr.bf16.mxu0 %v1418_v22 }
  0xa9   : > { %1256 = vmatmul.mubr.bf16.vlgmr.msra.gmra.mrb[0].mxu0 %v403_v15  ;;  %1274 = vmatpush3.bf16.msra.mxu1 %v1417_v21 }
  0xaa   : > { %1280 = vmatpush3.bf16.msra.mxu0 %v1418_v22  ;;  %1299 = vmatprep.subr.bf16.mxu1 %v1426_v61 }
  0xab   : > { %1281 = vmatprep.subr.bf16.mxu0 %v1419_v23 }
  0xae   : > { %1282 = vmatpush3.bf16.msra.mxu0 %v1419_v23 }
  0xaf   : > { %1283 = vmatprep.subr.bf16.mxu0 %v1420_v55 }
  0xb2   : > { %1284 = vmatpush3.bf16.msra.mxu0 %v1420_v55 }
  0xb3   : > { %1285 = vmatprep.subr.bf16.mxu0 %v1421_v56 }
  0xb6   : > { %1286 = vmatpush3.bf16.msra.mxu0 %v1421_v56 }
  0xb7   : > { %1287 = vmatprep.subr.bf16.mxu0 %v1422_v57 }
  0xba   : > { %1288 = vmatpush3.bf16.msra.mxu0 %v1422_v57 }
  0xbb   : > { %1289 = vmatprep.subr.bf16.mxu0 %v1423_v58 }
  0xbe   : > { %1290 = vmatpush3.bf16.msra.mxu0 %v1423_v58 }
  0xbf   : > { %1291 = vmatprep.subr.bf16.mxu0 %v1424_v59 }
  0xc2   : > { %1292 = vmatpush3.bf16.msra.mxu0 %v1424_v59 }
  0xc3   : > { %1293 = vmatprep.subr.bf16.mxu0 %v1425_v60 }
  0xc6   : > { %1294 = vmatpush3.bf16.msra.mxu0 %v1425_v60 }
 0x17c   : > { %v1257_v25 = vpop.f32.mrb[0].mxu0 }
 0x17d   : > { %v518_v26 = vadd.f32 %v1257_v25, %v1156_v24  ;;  %v509_v27 = vpop.f32.mrb[1].mxu0 }
 0x17e   : > { %v510_v28 = vadd.f32 %v1156_v24, %v509_v27  ;;  %v1258_v29 = vpop.f32.mrb[2].mxu0 }
 0x17f   : > { %v530_v30 = vmul.f32 0.70710677, %v518_v26  ;;  %v521_v31 = vadd.f32 %v1258_v29, %v1156_v24  ;;  %v512_v32 = vpop.f32.mrb[3].mxu0  ;;  %v526_v43 = vmul.f32 0.5, %v518_v26 }
 0x180   : > { %v528_v33 = vmul.f32 0.70710677, %v510_v28  ;;  %v513_v34 = vadd.f32 %v1156_v24, %v512_v32  ;;  %v524_v46 = vmul.f32 0.5, %v510_v28 }
 0x181   : > { %1434 = verf.f32 %v530_v30  ;;  %v531_v35 = vmul.f32 0.70710677, %v521_v31  ;;  %v527_v44 = vmul.f32 0.5, %v521_v31 }
 0x182   : > { %1436 = verf.f32 %v528_v33  ;;  %v529_v36 = vmul.f32 0.70710677, %v513_v34  ;;  %v525_v47 = vmul.f32 0.5, %v513_v34  ;;  %v1428_v34 = vld [vmem:[#allocation8 + $0x10] sm:$0xff]  }
 0x183   : > { %1438 = verf.f32 %v531_v35  ;;  %v1429_v35 = vld [vmem:[#allocation8 + $0x18] sm:$0xff]  }
 0x184   : > { %1440 = verf.f32 %v529_v36  ;;  %v1430_v36 = vld [vmem:[#allocation8 + $0x20] sm:$0xff]  }
 0x18b   : > { %v1435_v37 = vpop.eup %1434 }
 0x18c   : > { %v1437_v38 = vpop.eup %1436  ;;  %v538_v39 = vadd.f32 1.0, %v1435_v37  ;;  %v1431_v37 = vld [vmem:[#allocation8 + $0x28] sm:$0xff]  }
 0x18d   : > { %v1439_v40 = vpop.eup %1438  ;;  %v536_v41 = vadd.f32 1.0, %v1437_v38  ;;  %v1432_v38 = vld [vmem:[#allocation8 + $0x30] sm:$0xff]  }
 0x18e   : > { %v1441_v42 = vpop.eup %1440  ;;  %v539_v45 = vadd.f32 1.0, %v1439_v40  ;;  %v542_v49 = vmul.f32 %v538_v39, %v526_v43  ;;  %v1433_v39 = vld [vmem:[#allocation8 + $0x38] sm:$0xff]   ;;  %v705_v40 = vsub.s32 1, %v564_v0 }
 0x18f   : > { %v537_v48 = vadd.f32 1.0, %v1441_v42  ;;  %v540_v51 = vmul.f32 %v536_v41, %v524_v46 }
 0x190   : > { %v543_v50 = vmul.f32 %v539_v45, %v527_v44  ;;  %v706_v41 = vrot.slane %v544_v2, %v705_v40 }
 0x191   : > { %v541_v52 = vmul.f32 %v537_v48, %v525_v47 }
 0x192   : > { %v562_v53 = vpack.c.bf16 %v543_v50, %v542_v49 }
 0x193   : > { %v561_v54 = vpack.c.bf16 %v541_v52, %v540_v51 }
 0x195   : > { %1275 = vmatprep.mubr.bf16.mxu1 %v561_v54 }
 0x196   : > { %1276 = vmatmul.mubr.bf16.vlgmr.msra.gmra.mrb[0].mxu1 %v562_v53 }
 0x197   : > { %1300 = vmatpush3.bf16.msra.mxu1 %v1426_v61 }
 0x198   : > { %1301 = vmatprep.subr.bf16.mxu1 %v1427_v62 }
 0x19b   : > { %1302 = vmatpush3.bf16.msra.mxu1 %v1427_v62 }
 0x19c   : > { %1303 = vmatprep.subr.bf16.mxu1 %v1428_v34 }
 0x19f   : > { %1304 = vmatpush3.bf16.msra.mxu1 %v1428_v34 }
 0x1a0   : > { %1305 = vmatprep.subr.bf16.mxu1 %v1429_v35 }
 0x1a3   : > { %1306 = vmatpush3.bf16.msra.mxu1 %v1429_v35 }
 0x1a4   : > { %1307 = vmatprep.subr.bf16.mxu1 %v1430_v36 }
 0x1a7   : > { %1308 = vmatpush3.bf16.msra.mxu1 %v1430_v36 }
 0x1a8   : > { %1309 = vmatprep.subr.bf16.mxu1 %v1431_v37 }
 0x1ab   : > { %1310 = vmatpush3.bf16.msra.mxu1 %v1431_v37 }
 0x1ac   : > { %1311 = vmatprep.subr.bf16.mxu1 %v1432_v38 }
 0x1af   : > { %1312 = vmatpush3.bf16.msra.mxu1 %v1432_v38 }
 0x1b0   : > { %1313 = vmatprep.subr.bf16.mxu1 %v1433_v39 }
 0x1b3   : > { %1314 = vmatpush3.bf16.msra.mxu1 %v1433_v39 }
 0x269   : > { %v1277_v4 = vpop.f32.mrb[0].mxu1 }
 0x26a   : > { %v658_v5 = vadd.f32 %v1277_v4, %v566_v3  ;;  %v649_v6 = vpop.f32.mrb[1].mxu1 }
 0x26b   : > { %v650_v7 = vadd.f32 %v649_v6, %v566_v3  ;;  %v1278_v8 = vpop.f32.mrb[2].mxu1 }
 0x26c   : > { %v670_v9 = vmul.f32 0.70710677, %v658_v5  ;;  %v661_v10 = vadd.f32 %v1278_v8, %v566_v3  ;;  %v652_v11 = vpop.f32.mrb[3].mxu1  ;;  %v666_v22 = vmul.f32 0.5, %v658_v5 }
 0x26d   : > { %v668_v12 = vmul.f32 0.70710677, %v650_v7  ;;  %v653_v13 = vadd.f32 %v652_v11, %v566_v3  ;;  %v664_v25 = vmul.f32 0.5, %v650_v7 }
 0x26e   : > { %1442 = verf.f32 %v670_v9  ;;  %v671_v14 = vmul.f32 0.70710677, %v661_v10  ;;  %v667_v23 = vmul.f32 0.5, %v661_v10  ;;  %v1181_v9 = vld [vmem:[%s2022_s6] ss:$0 sm:$0xff] }
 0x26f   : > { %1444 = verf.f32 %v668_v12  ;;  %v669_v15 = vmul.f32 0.70710677, %v653_v13  ;;  %v665_v26 = vmul.f32 0.5, %v653_v13 }
 0x270   : > { %1446 = verf.f32 %v671_v14 }
 0x271   : > { %1448 = verf.f32 %v669_v15 }
 0x278   : > { %v1443_v16 = vpop.eup %1442 }
 0x279   : > { %v1445_v17 = vpop.eup %1444  ;;  %v678_v18 = vadd.f32 1.0, %v1443_v16 }
 0x27a   : > { %v1447_v19 = vpop.eup %1446  ;;  %v676_v20 = vadd.f32 1.0, %v1445_v17 }
 0x27b   : > { %v1449_v21 = vpop.eup %1448  ;;  %v679_v24 = vadd.f32 1.0, %v1447_v19  ;;  %v682_v28 = vmul.f32 %v678_v18, %v666_v22  ;;  %v947_v18 = vand.u32 127, %v563_v63 }
 0x27c   : > { %v677_v27 = vadd.f32 1.0, %v1449_v21  ;;  %v680_v30 = vmul.f32 %v676_v20, %v664_v25 }
 0x27d   : > { %v683_v29 = vmul.f32 %v679_v24, %v667_v23  ;;  %vm948_vm0 = vcmp.lt.s32.totalorder %v947_v18, 16 }
 0x27e   : > { %v681_v31 = vmul.f32 %v677_v27, %v665_v26 }
 0x27f   : > { %v702_v32 = vpack.c.bf16 %v683_v29, %v682_v28 }
 0x280   : > { %v701_v33 = vpack.c.bf16 %v681_v31, %v680_v30 }
 0x282   : > { %1295 = vmatprep.mubr.bf16.mxu0 %v701_v33 }
 0x283   : > { %1296 = vmatmul.mubr.bf16.vlgmr.msra.gmra.mrb[4].mxu0 %v702_v32 }
 0x356   : > { %v1297_v42 = vpop.f32.mrb[4].mxu0 }
 0x357   : > { %v798_v43 = vadd.f32 %v1297_v42, %v706_v41  ;;  %v789_v44 = vpop.f32.mrb[5].mxu0 }
 0x358   : > { %v790_v45 = vadd.f32 %v789_v44, %v706_v41  ;;  %v1298_v46 = vpop.f32.mrb[6].mxu0 }
 0x359   : > { %v810_v47 = vmul.f32 0.70710677, %v798_v43  ;;  %v801_v48 = vadd.f32 %v1298_v46, %v706_v41  ;;  %v792_v49 = vpop.f32.mrb[7].mxu0  ;;  %v806_v60 = vmul.f32 0.5, %v798_v43 }
 0x35a   : > { %v808_v50 = vmul.f32 0.70710677, %v790_v45  ;;  %v793_v51 = vadd.f32 %v792_v49, %v706_v41  ;;  %v804_v0 = vmul.f32 0.5, %v790_v45 }
 0x35b   : > { %1450 = verf.f32 %v810_v47  ;;  %v811_v52 = vmul.f32 0.70710677, %v801_v48  ;;  %v807_v61 = vmul.f32 0.5, %v801_v48 }
 0x35c   : > { %1452 = verf.f32 %v808_v50  ;;  %v809_v53 = vmul.f32 0.70710677, %v793_v51  ;;  %v805_v1 = vmul.f32 0.5, %v793_v51  ;;  %v1190_v51 = vld [vmem:[%s2023_s7] ss:$0 sm:$0xff] }
 0x35d   : > { %1454 = verf.f32 %v811_v52 }
 0x35e   : > { %1456 = verf.f32 %v809_v53  ;;  %v1191_v53 = vld [vmem:[%s2024_s8] ss:$0 sm:$0xff] }
 0x365   : > { %v1451_v54 = vpop.eup %1450 }
 0x366   : > { %v1453_v55 = vpop.eup %1452  ;;  %v818_v56 = vadd.f32 1.0, %v1451_v54 }
 0x367   : > { %v1455_v57 = vpop.eup %1454  ;;  %v816_v58 = vadd.f32 1.0, %v1453_v55 }
 0x368   : > { %v1457_v59 = vpop.eup %1456  ;;  %v819_v62 = vadd.f32 1.0, %v1455_v57  ;;  %v822_v3 = vmul.f32 %v818_v56, %v806_v60 }
 0x369   : > { %v817_v2 = vadd.f32 1.0, %v1457_v59  ;;  %v820_v5 = vmul.f32 %v816_v58, %v804_v0 }
 0x36a   : > { %v823_v4 = vmul.f32 %v819_v62, %v807_v61 }
 0x36b   : > { %v821_v6 = vmul.f32 %v817_v2, %v805_v1 }
 0x36c   : > { %v825_v7 = vpack.c.bf16 %v823_v4, %v822_v3 }
 0x36d   : > { %v824_v8 = vpack.c.bf16 %v821_v6, %v820_v5 }
 0x36f   : > { %1315 = vmatprep.mubr.bf16.mxu1 %v824_v8 }
 0x370   : > { %1316 = vmatmul.mubr.bf16.vlgmr.msra.gmra.mrb[4].mxu1 %v825_v7 }
 0x443   : > { %v1317_v10 = vpop.f32.mrb[4].mxu1 }
 0x444   : > { %v940_v11 = vadd.f32 %v1317_v10, %v1181_v9  ;;  %v931_v12 = vpop.f32.mrb[5].mxu1 }
 0x445   : > { %v932_v13 = vadd.f32 %v1181_v9, %v931_v12  ;;  %v1318_v14 = vpop.f32.mrb[6].mxu1 }
 0x446   : > { %953 = vadd.xlane.f32.xlu1 %v940_v11  ;;  %v934_v15 = vpop.f32.mrb[7].mxu1  ;;  %v943_v16 = vadd.f32 %v1318_v14, %v1181_v9 }
 0x447   : > { %949 = vadd.xlane.f32.xlu0 %v932_v13  ;;  %v935_v17 = vadd.f32 %v1181_v9, %v934_v15 }
 0x44a   : > { %955 = vadd.xlane.f32.xlu1 %v943_v16 }
 0x44b   : > { %951 = vadd.xlane.f32.xlu0 %v935_v17 }
 0x4d3   : > { %v954_v19 = vpop.xlane.xlu1 %953 }
 0x4d4   : > { %v959_v20 = vmul.f32 0.0625, %v954_v19  ;;  %v950_v21 = vpop.xlane.xlu0 %949 }
 0x4d5   : > { %v957_v22 = vmul.f32 0.0625, %v950_v21 }
 0x4d6   : > { %v963_v23 = vsub.f32 %v940_v11, %v959_v20 }
 0x4d7   : > { %v961_v24 = vsub.f32 %v932_v13, %v957_v22  ;;  %v956_v25 = vpop.xlane.xlu1 %955 }
 0x4d8   : > { %v960_v26 = vmul.f32 0.0625, %v956_v25  ;;  %v952_v27 = vpop.xlane.xlu0 %951  ;;  %v969_v33 = vsel %vm948_vm0, %v963_v23, 0.0 }
 0x4d9   : > { %v958_v28 = vmul.f32 0.0625, %v952_v27  ;;  %v967_v29 = vsel %vm948_vm0, %v961_v24, 0.0  ;;  %v973_v34 = vmul.f32 %v969_v33, %v969_v33 }
 0x4da   : > { %v971_v30 = vmul.f32 %v967_v29, %v967_v29  ;;  %v964_v31 = vsub.f32 %v943_v16, %v960_v26 }
 0x4db   : > { %v962_v32 = vsub.f32 %v935_v17, %v958_v28 }
 0x4dc   : > { %975 = vadd.xlane.f32.xlu0 %v971_v30  ;;  %v970_v36 = vsel %vm948_vm0, %v964_v31, 0.0 }
 0x4dd   : > { %v968_v63 = vsel %vm948_vm0, %v962_v32, 0.0  ;;  %v974_v37 = vmul.f32 %v970_v36, %v970_v36 }
 0x4de   : > { %v972_v35 = vmul.f32 %v968_v63, %v968_v63 }
 0x4e0   : > { %979 = vadd.xlane.f32.xlu0 %v973_v34  ;;  %977 = vadd.xlane.f32.xlu1 %v972_v35 }
 0x4e4   : > { %981 = vadd.xlane.f32.xlu1 %v974_v37 }
 0x569   : > { %v976_v38 = vpop.xlane.xlu0 %975 }
 0x56a   : > { %v983_v39 = vmul.f32 0.0625, %v976_v38 }
 0x56c   : > { %v987_v40 = vadd.f32 1e-05, %v983_v39 }
 0x56d   : > { %v978_v41 = vpop.xlane.xlu1 %977  ;;  %v980_v42 = vpop.xlane.xlu0 %979 }
 0x56e   : > { %1458 = vrsqrt.f32 %v987_v40  ;;  %v984_v43 = vmul.f32 0.0625, %v978_v41  ;;  %v985_v44 = vmul.f32 0.0625, %v980_v42 }
 0x570   : > { %v988_v45 = vadd.f32 1e-05, %v984_v43  ;;  %v989_v46 = vadd.f32 1e-05, %v985_v44 }
 0x571   : > { %v982_v47 = vpop.xlane.xlu1 %981 }
 0x572   : > { %1460 = vrsqrt.f32 %v988_v45  ;;  %v986_v48 = vmul.f32 0.0625, %v982_v47 }
 0x573   : > { %1462 = vrsqrt.f32 %v989_v46 }
 0x574   : > { %v990_v49 = vadd.f32 1e-05, %v986_v48 }
 0x576   : > { %1464 = vrsqrt.f32 %v990_v49 }
 0x578   : > { %v1459_v50 = vpop.eup %1458 }
 0x579   : > { %v995_v52 = vmul.f32 %v1459_v50, %v967_v29 }
 0x57b   : > { %v1006_v54 = vmul.f32 %v1190_v51, %v995_v52 }
 0x57c   : > { %v1461_v55 = vpop.eup %1460 }
 0x57d   : > { %v1463_v56 = vpop.eup %1462  ;;  %v1017_v57 = vadd.f32 %v1191_v53, %v1006_v54  ;;  %v996_v58 = vmul.f32 %v1461_v55, %v968_v63 }
 0x57e   : > { %v997_v59 = vmul.f32 %v1463_v56, %v969_v33 }
 0x57f   : > { %1021 = vst [vmem:[%s394_s30] sm:$0xff] %v1017_v57  ;;  %v1007_v60 = vmul.f32 %v1190_v51, %v996_v58 }
 0x580   : > { %v1465_v61 = vpop.eup %1464  ;;  %v1008_v62 = vmul.f32 %v1190_v51, %v997_v59 }
 0x581   : > { %v1018_v0 = vadd.f32 %v1191_v53, %v1007_v60  ;;  %v998_v1 = vmul.f32 %v1465_v61, %v970_v36 }
 0x582   : > { %v1019_v2 = vadd.f32 %v1191_v53, %v1008_v62 }
 0x583   : > { %1022 = vst [vmem:[%s394_s30 + $0x8] sm:$0xff] %v1018_v0  ;;  %v1009_v3 = vmul.f32 %v1190_v51, %v998_v1 }
 0x584   : > { %1023 = vst [vmem:[%s394_s30 + $0x10] sm:$0xff] %v1019_v2 }
 0x585   : > { %v1020_v4 = vadd.f32 %v1191_v53, %v1009_v3 }
 0x587   : > { %1024 = vst [vmem:[%s394_s30 + $0x18] sm:$0xff] %v1020_v4 }
 0x588   : > { %1593 = shalt.err (!%p1590_p4)
}
 0x589   : > { %s1594_s21 = scalar_lea.hbm %s1970_s23, 512  ;;  %s1598_s30 = scalar_lea.hbm %s2049_s18, 1024 }
 0x58a   : > { %p1595_p9 = scmp.ne.s32.totalorder %s1970_s23, %s1594_s21  ;;  %p1599_p8 = scmp.lt.u32.totalorder %s1970_s23, %s2049_s18 }
 0x58b   : > { %p1600_p13 = scmp.lt.u32.totalorder %s1598_s30, %s1594_s21  ;;  %p1602_p10 = scmp.lt.u32.totalorder %s1594_s21, %s1970_s23 }
 0x58c   : > { %p1596_p0 = pnand %p1595_p9, %p1871_p5 }
 0x58d   : > { %p1601_p6 = por %p1600_p13, %p1599_p8 }
 0x58e   : > { %p1597_p11 = pneg %p1596_p0 }
 0x58f   : > { %p1603_p3 = por %p1602_p10, %p1601_p6 }
 0x591   : > { %p1604_p7 = pnand %p1603_p3, %p1597_p11 }
 0x593   : > { %1607 = shalt.err (!%p1604_p7)
}
 0x594   : > { %s1665_s17 = smov 128   ;;  %s1666_s19 = smov 8  }
 0x595   : > { %1333 = dma.vmem_to_hbm [thread:$0]  (%p1871_p5), %s1972_s28, 512, %s1970_s23, %s1026_s24, %s1665_s17, %s1665_s17, %s1666_s19  }
 0x596 PF: > { %s2050_s13 = sld [smem:[#allocation15_spill]]  ;;  %s2051_s22 = sld [smem:[#allocation16_spill]] }
 0x597   : > { %p2053_p1 = scmp.ge.s32.totalorder %s1654_s12, 2 }
 0x59c   : > { %s1054_s26 = sand.u32 1, %s2050_s13   ;;  %p2052_p12 = scmp.ne.s32.totalorder %s2051_s22, 0 }
 0x59d   : > { %s1055_s21 = scalar_lea.sflag [#allocation4], %s1054_s26 }
 0x59e   : > { %p1350_p2 = pnand %p2053_p1, %p2052_p12 }
 0x5a0   : > { %1637 = dma.done.wait (!%p1350_p2), %s1055_s21, 512  }
 0x5a1   : > { %1639 = vsyncadd (!%p1350_p2), %s1055_s21, 4294966784  ;;  %p24_p4 = scmp.ge.s32.totalorder %s1857_s14, 4   ;;  %s2054_s30 = smov %s1646_s10 }
 0x5a2   : > { %s2055_s10 = smov %s1650_s11  ;;  %s2056_s11 = smov %s1867_s16 }
 0x5a3   : > { %s2057_s12 = smov %s1857_s14  ;;  %26 = sbr.rel (!%p24_p4) target bundleno = 9 (0x9), region = 114 }
 0x5aa   :  { %1060 = vsyncpa [#allocation3], 1 }
 0x5ab   :  { %1062 = vsyncpa [#allocation3 + $0x1], 1 }
 0x5ac   :  { %1063 = vsyncpa [#allocation6], 1 }
 0x5ad   :  { %1064 = vsyncpa [#allocation9], 1 }
 0x5ae   :  { %1065 = vsyncpa [#allocation4], 1 }
 0x5af   :  { %1067 = vsyncpa [#allocation4 + $0x1], 1 }

</bundles_post_ra>
